<compile_context>
chip_gen: v5e
topology: v5e:2x2
jax: 0.10.0
libtpu: 0.0.40
codegen_flags: <defaults>
</compile_context>

<pallas_src>
import functools

import jax
import jax.numpy as jnp
from jax.experimental import pallas as pl
from jax.experimental.pallas import tpu as pltpu

# config from the reference module
TEXT_HIDDEN = 128     # text_hidden_dims
AUDIO_HIDDEN = 256    # audio_hidden_dims
NUM_CLASSES = 2       # num_classes
BATCH = 4             # batch_size


def _myloss_kernel(target_ref, feat_ref, w_ref, out_ref, *, text_hidden):
    """CE(x_text @ Wt.T, y) + CE(x_audio @ Wa.T, y), both mean-reduced.

    target_ref : [B, 1]      int32  (VMEM)
    feat_ref   : [B, Ht+Ha]  f32    (VMEM)  fused [text | audio] features
    w_ref      : [C, Ht+Ha]  f32    (VMEM)  fc_final[0].weight, original layout
    out_ref    : [1, 1]      f32    (SMEM scalar)
    """
    B, K = feat_ref.shape
    C = w_ref.shape[0]
    Ht = text_hidden  # static; slices below are lane-aligned when Ht % 128 == 0

    x = feat_ref[...]                                   # [B, K]
    tgt = target_ref[...]                               # [B, 1] int32

    if C == 2:
        # --- MXU-free fast path --------------------------------------------
        # CE over 2 classes:  loss_i = log(1 + exp(l_other - l_true))
        #                            = softplus(sign_i * (x_i · (w1 - w0)))
        # with sign_i = +1 if y_i == 0 else -1, restricted per modality to its
        # slice of the hidden axis.
        wd = w_ref[1:2, :] - w_ref[0:1, :]              # [1, K]  (VPU)
        prod = x * wd                                   # [B, K]  sublane bcast
        gap_t = jnp.sum(prod[:, 0:Ht], axis=-1, keepdims=True)   # [B, 1]
        gap_a = jnp.sum(prod[:, Ht:K], axis=-1, keepdims=True)   # [B, 1]

        sign = 1.0 - 2.0 * tgt.astype(jnp.float32)      # [B, 1] (+1 / -1)
        z_t = sign * gap_t
        z_a = sign * gap_a

        def softplus_mean(z):
            # stable softplus: log(1 + e^z) = max(z, 0) + log(1 + e^{-|z|})
            return jnp.mean(
                jnp.maximum(z, 0.0) + jnp.log(1.0 + jnp.exp(-jnp.abs(z)))
            )

        out_ref[0, 0] = softplus_mean(z_t) + softplus_mean(z_a)
    else:
        # --- general path: x @ W.T per modality + stable LSE CE -------------
        dn = (((1,), (1,)), ((), ()))  # contract feature dim 1 vs weight dim 1
        logits_t = jax.lax.dot_general(
            x[:, 0:Ht], w_ref[:, 0:Ht], dn, preferred_element_type=jnp.float32
        )  # [B, C]
        logits_a = jax.lax.dot_general(
            x[:, Ht:K], w_ref[:, Ht:K], dn, preferred_element_type=jnp.float32
        )  # [B, C]

        col_ids = jax.lax.broadcasted_iota(jnp.int32, (B, C), 1)
        mask = (col_ids == tgt).astype(jnp.float32)     # one broadcast compare

        def ce_mean(logits):
            m = jnp.max(logits, axis=-1, keepdims=True)
            lse = m[:, 0] + jnp.log(jnp.sum(jnp.exp(logits - m), axis=-1))
            true_logit = jnp.sum(mask * logits, axis=-1)
            return jnp.mean(lse - true_logit)

        out_ref[0, 0] = ce_mean(logits_t) + ce_mean(logits_a)


def my_loss_fused(fused_feature, target, fc_final_weight, *, text_hidden=TEXT_HIDDEN):
    """Kernel entry point on the already-fused feature tensor [B, Ht+Ha]."""
    B, K = fused_feature.shape
    C, K2 = fc_final_weight.shape
    assert K == K2, (K, K2)
    # Note: text_hidden % 128 == 0 keeps the in-kernel hidden-axis split
    # lane-aligned (no VMEM copy); other values are still correct.

    cost = pl.CostEstimate(
        flops=4 * B * K + 16 * B,
        transcendentals=4 * B,
        bytes_accessed=4 * (B * K + C * K + B) + 4,
    )

    out = pl.pallas_call(
        functools.partial(_myloss_kernel, text_hidden=text_hidden),
        out_shape=jax.ShapeDtypeStruct((1, 1), jnp.float32),
        in_specs=[
            pl.BlockSpec(memory_space=pltpu.VMEM),   # target  [B, 1] int32
            pl.BlockSpec(memory_space=pltpu.VMEM),   # fused   [B, Ht+Ha]
            pl.BlockSpec(memory_space=pltpu.VMEM),   # weight  [C, Ht+Ha]
        ],
        out_specs=pl.BlockSpec(memory_space=pltpu.SMEM),
        cost_estimate=cost,
    )(
        target.astype(jnp.int32).reshape(B, 1),
        fused_feature.astype(jnp.float32),
        fc_final_weight.astype(jnp.float32),
    )
    return out[0, 0]


def my_loss(text_feature, audio_feature, target, fc_final_weight):
    """Matches MyLoss.forward(text_feature, audio_feature, target, model).

    The fuse-net forward already holds the concatenated [text | audio] tensor,
    so in production pass that directly to `my_loss_fused`; here we concat once
    in the wrapper (a trivial XLA op outside the kernel).
    """
    fused = jnp.concatenate(
        [text_feature.astype(jnp.float32), audio_feature.astype(jnp.float32)],
        axis=-1,
    )
    return my_loss_fused(
        fused, target, fc_final_weight, text_hidden=text_feature.shape[1]
    )


def _reference_loss(text_feature, audio_feature, target, fc_final_weight):
    """Pure-JAX reference mirroring the PyTorch MyLoss for sanity checking."""
    Ht = text_feature.shape[1]
    logits_t = text_feature @ fc_final_weight[:, :Ht].T
    logits_a = audio_feature @ fc_final_weight[:, Ht:].T

    def ce(logits, tgt):
        logp = jax.nn.log_softmax(logits, axis=-1)
        return -jnp.mean(jnp.take_along_axis(logp, tgt[:, None], axis=-1))

    return ce(logits_t, target) + ce(logits_a, target)


if __name__ == "__main__":
    key = jax.random.PRNGKey(0)
    k1, k2, k3, k4 = jax.random.split(key, 4)

    # deterministic synthetic inputs / parameters (shapes from the module config)
    text_feature = jax.random.normal(k1, (BATCH, TEXT_HIDDEN), dtype=jnp.float32)
    audio_feature = jax.random.normal(k2, (BATCH, AUDIO_HIDDEN), dtype=jnp.float32)
    target = jax.random.randint(k3, (BATCH,), 0, NUM_CLASSES, dtype=jnp.int32)
    # model.fc_final[0] = nn.Linear(Ht + Ha, num_classes, bias=False)
    fan_in = TEXT_HIDDEN + AUDIO_HIDDEN
    bound = 1.0 / jnp.sqrt(jnp.float32(fan_in))
    fc_final_weight = jax.random.uniform(
        k4, (NUM_CLASSES, fan_in), minval=-bound, maxval=bound, dtype=jnp.float32
    )

    loss = my_loss(text_feature, audio_feature, target, fc_final_weight)
    loss = jax.block_until_ready(loss)

    ref = _reference_loss(text_feature, audio_feature, target, fc_final_weight)
    ref = jax.block_until_ready(ref)
    assert jnp.allclose(loss, ref, atol=1e-4, rtol=1e-4), (loss, ref)

    print("KERNEL_OK")
</pallas_src>

<mosaic_0001>
module attributes {stable_mosaic.version = 11 : i64} {
  func.func @_myloss_kernel(%arg0: memref<4x1xi32, #tpu.memory_space<vmem>>, %arg1: memref<4x384xf32, #tpu.memory_space<vmem>>, %arg2: memref<2x384xf32, #tpu.memory_space<vmem>>, %arg3: memref<1x1xf32, #tpu.memory_space<smem>>) attributes {dimension_semantics = [], scalar_prefetch = 0 : i64, scratch_operands = 0 : i64, tpu.core_type = #tpu.core_type<tc>} {
    %c0 = arith.constant 0 : index
    %c0_0 = arith.constant 0 : index
    %0 = vector.load %arg1[%c0, %c0_0] : memref<4x384xf32, #tpu.memory_space<vmem>>, vector<4x384xf32>
    %c0_1 = arith.constant 0 : index
    %c0_2 = arith.constant 0 : index
    %1 = vector.load %arg0[%c0_1, %c0_2] : memref<4x1xi32, #tpu.memory_space<vmem>>, vector<4x1xi32>
    %c1 = arith.constant 1 : index
    %c0_3 = arith.constant 0 : index
    %2 = vector.load %arg2[%c1, %c0_3] : memref<2x384xf32, #tpu.memory_space<vmem>>, vector<1x384xf32>
    %c0_4 = arith.constant 0 : index
    %c0_5 = arith.constant 0 : index
    %3 = vector.load %arg2[%c0_4, %c0_5] : memref<2x384xf32, #tpu.memory_space<vmem>>, vector<1x384xf32>
    %4 = arith.subf %2, %3 : vector<1x384xf32>
    %5 = vector.broadcast %4 : vector<1x384xf32> to vector<4x384xf32>
    %6 = arith.mulf %0, %5 : vector<4x384xf32>
    %7 = vector.extract_strided_slice %6 {offsets = [0, 0], sizes = [4, 128], strides = [1, 1]} : vector<4x384xf32> to vector<4x128xf32>
    %cst = arith.constant dense<0.000000e+00> : vector<4xf32>
    %8 = vector.multi_reduction <add>, %7, %cst [1] : vector<4x128xf32> to vector<4xf32>
    %9 = vector.shape_cast %8 : vector<4xf32> to vector<4x1xf32>
    %10 = vector.extract_strided_slice %6 {offsets = [0, 128], sizes = [4, 256], strides = [1, 1]} : vector<4x384xf32> to vector<4x256xf32>
    %cst_6 = arith.constant dense<0.000000e+00> : vector<4xf32>
    %11 = vector.multi_reduction <add>, %10, %cst_6 [1] : vector<4x256xf32> to vector<4xf32>
    %12 = vector.shape_cast %11 : vector<4xf32> to vector<4x1xf32>
    %13 = arith.sitofp %1 : vector<4x1xi32> to vector<4x1xf32>
    %cst_7 = arith.constant 2.000000e+00 : f32
    %14 = vector.broadcast %cst_7 : f32 to vector<4x1xf32>
    %15 = arith.mulf %14, %13 : vector<4x1xf32>
    %cst_8 = arith.constant 1.000000e+00 : f32
    %16 = vector.broadcast %cst_8 : f32 to vector<4x1xf32>
    %17 = arith.subf %16, %15 : vector<4x1xf32>
    %18 = arith.mulf %17, %9 : vector<4x1xf32>
    %19 = arith.mulf %17, %12 : vector<4x1xf32>
    %cst_9 = arith.constant 0.000000e+00 : f32
    %20 = vector.broadcast %cst_9 : f32 to vector<4x1xf32>
    %21 = arith.maximumf %18, %20 : vector<4x1xf32>
    %22 = math.absf %18 : vector<4x1xf32>
    %cst_10 = arith.constant 0.000000e+00 : f32
    %23 = vector.broadcast %cst_10 : f32 to vector<4x1xf32>
    %24 = arith.subf %23, %22 : vector<4x1xf32>
    %25 = math.exp %24 : vector<4x1xf32>
    %cst_11 = arith.constant 1.000000e+00 : f32
    %26 = vector.broadcast %cst_11 : f32 to vector<4x1xf32>
    %27 = arith.addf %26, %25 : vector<4x1xf32>
    %28 = math.log %27 : vector<4x1xf32>
    %29 = arith.addf %21, %28 : vector<4x1xf32>
    %30 = vector.shape_cast %29 : vector<4x1xf32> to vector<1x4x1xf32>
    %cst_12 = arith.constant dense<0.000000e+00> : vector<1xf32>
    %31 = vector.multi_reduction <add>, %30, %cst_12 [1, 2] : vector<1x4x1xf32> to vector<1xf32>
    %32 = vector.shape_cast %31 : vector<1xf32> to vector<1x1x1xf32>
    %33 = vector.extract %32[0, 0, 0] : f32 from vector<1x1x1xf32>
    %cst_13 = arith.constant 4.000000e+00 : f32
    %34 = arith.divf %33, %cst_13 : f32
    %cst_14 = arith.constant 0.000000e+00 : f32
    %35 = vector.broadcast %cst_14 : f32 to vector<4x1xf32>
    %36 = arith.maximumf %19, %35 : vector<4x1xf32>
    %37 = math.absf %19 : vector<4x1xf32>
    %cst_15 = arith.constant 0.000000e+00 : f32
    %38 = vector.broadcast %cst_15 : f32 to vector<4x1xf32>
    %39 = arith.subf %38, %37 : vector<4x1xf32>
    %40 = math.exp %39 : vector<4x1xf32>
    %cst_16 = arith.constant 1.000000e+00 : f32
    %41 = vector.broadcast %cst_16 : f32 to vector<4x1xf32>
    %42 = arith.addf %41, %40 : vector<4x1xf32>
    %43 = math.log %42 : vector<4x1xf32>
    %44 = arith.addf %36, %43 : vector<4x1xf32>
    %45 = vector.shape_cast %44 : vector<4x1xf32> to vector<1x4x1xf32>
    %cst_17 = arith.constant dense<0.000000e+00> : vector<1xf32>
    %46 = vector.multi_reduction <add>, %45, %cst_17 [1, 2] : vector<1x4x1xf32> to vector<1xf32>
    %47 = vector.shape_cast %46 : vector<1xf32> to vector<1x1x1xf32>
    %48 = vector.extract %47[0, 0, 0] : f32 from vector<1x1x1xf32>
    %cst_18 = arith.constant 4.000000e+00 : f32
    %49 = arith.divf %48, %cst_18 : f32
    %50 = arith.addf %34, %49 : f32
    %c0_19 = arith.constant 0 : index
    %c0_20 = arith.constant 0 : index
    %51 = memref.load %arg3[%c0_19, %c0_20] : memref<1x1xf32, #tpu.memory_space<smem>>
    memref.store %50, %arg3[%c0_19, %c0_20] : memref<1x1xf32, #tpu.memory_space<smem>>
    return
  }
}

</mosaic_0001>

<bundles_post_ra>
// kernel: tpu_custom_call.1
= control target key start
LH: loop header
LB: loop body
LE: loop exit
PB: predicated region body
PF: predicated region fallthrough
CT: control target
= control target key end

     0   :  { %8 = vsyncpa [#allocation3], 0  ;;  %s243_s0 = inlined_call_operand.vmem [shape: s32[4,1], index: 0, kind: input, shape index: {}]   ;;  %s244_s1 = inlined_call_operand.hbm [shape: f32[4,384], index: 1, kind: input, shape index: {}]   ;;  %s245_s2 = inlined_call_operand.vmem [shape: f32[2,384], index: 2, kind: input, shape index: {}]   ;;  %s246_s3 = inlined_call_operand.hbm [shape: f32[1,1], index: 3, kind: output, shape index: {}]  }
   0x1   :  { %9 = vsyncpa [#allocation4], 0  ;;  %s17_s14 = sshll.u32 %s244_s1, 4  ;;  %s205_s15 = smov [#allocation2]   ;;  %s18_s14 = int_to_ptr.hbm [resolvable:$true] %s17_s14 }
   0x2   :  { %s19_s16 = sshll.u32 %s205_s15, 4  ;;  %s20_s16 = int_to_ptr.vmem [resolvable:$true] %s19_s16 }
   0x3   :  { %22 = dma.hbm_to_vmem [thread:$0]  %s18_s14, 192, %s20_s16, [#allocation3]  }
   0x4   :  { %201 = dma.done.wait [#allocation3], 192  }
   0x5   :  { %202 = vsyncadd [#allocation3], 4294967104  ;;  %v145_v0 = vld [vmem:[%s245_s2 + $0x1] ss:$2 sm:$0x7]  ;;  %vm42_vm0 = vcmask 1043456  }
   0x6   :  { %v34_v1 = vld [vmem:[%s245_s2] ss:$2 sm:$0x7]  ;;  %v30_v3 = vld [vmem:[#allocation2 + $0x8] sm:$0xf]  ;;  %v29_v7 = vld [vmem:[#allocation2] sm:$0xff] }
   0x7   :  { %v35_v2 = vsub.f32 %v145_v0, %v34_v1  ;;  %v31_v18 = vld [vmem:[%s243_s0] sm:$0xf]  ;;  %vm78_vm1 = vcmask 3072   ;;  %v206_v46 = vmov 4.0   ;;  %s134_s24 = sshll.u32 %s246_s3, 4  ;;  %s207_s29 = smov [#allocation5]   ;;  %s135_s24 = int_to_ptr.hbm [resolvable:$true] %s134_s24 }
   0x8   :  { %v64_v19 = vcvt.s32.f32 %v31_v18 }
   0x9   :  { %v37_v4 = vperm.slane %v35_v2, 0  ;;  %v38_v5 = vperm.slane %v35_v2, 1  ;;  %v39_v6 = vperm.slane %v35_v2, 2 }
   0xa   :  { %v65_v20 = vmul.f32 2.0, %v64_v19 }
   0xb   :  { %v41_v8 = vrot.slane %v38_v5, 4  ;;  %v46_v9 = vmul.f32 %v39_v6, %v30_v3 }
   0xc   :  { %v66_v21 = vsub.f32 1.0, %v65_v20 }
   0xd   :  { %v43_v10 = vsel %vm42_vm0, %v37_v4, %v41_v8  ;;  %54 = vst [vmem:[#allocation1 + $0x10] ss:$2 sm:$0xff] %v46_v9 }
   0xe   :  { %v45_v11 = vmul.f32 %v43_v10, %v29_v7 }
  0x10   :  { %v47_v12 = vsel %vm42_vm0, %v45_v11, 0.0  ;;  %52 = vst [vmem:[#allocation1] ss:$2 sm:$0xff] %v45_v11 }
  0x11   :  { %48 = vadd.xlane.f32.xlu0 %v47_v12 }
  0x14   :  { %v56_v13 = vld.sshfl [vmem:[#allocation1 + $0x10] sm:$0xff pattern:$0x75316420] }
  0x15   :  { %v60_v14 = vsel %vm42_vm0, %v56_v13, 0.0 }
  0x17   :  { %v55_v15 = vld.sshfl [vmem:[#allocation1 + $0x8] sm:$0xff pattern:$0x75316420] }
  0x18   :  { %v59_v16 = vsel %vm42_vm0, %v55_v15, 0.0 }
  0x19   :  { %v61_v17 = vadd.f32 %v60_v14, %v59_v16 }
  0x1b   :  { %62 = vadd.xlane.f32.xlu0 %v61_v17 }
  0x84   :  { %v49_v22 = vpop.xlane.xlu0 %48 }
  0x85   :  { %v67_v23 = vmul.f32 %v66_v21, %v49_v22 }
  0x87   :  { %v70_v24 = vand.u32 2147483647, %v67_v23  ;;  %v69_v36 = vmax.f32 %v67_v23, 0.0 }
  0x89   :  { %v71_v25 = vsub.f32 0.0, %v70_v24 }
  0x8b   :  { %v72_v26 = vmul.f32 1.442695, %v71_v25 }
  0x8d   :  { %155 = vpow2.f32 %v72_v26 }
  0x8e   :  { %v63_v27 = vpop.xlane.xlu0 %62 }
  0x8f   :  { %v68_v28 = vmul.f32 %v66_v21, %v63_v27 }
  0x91   :  { %v99_v29 = vand.u32 2147483647, %v68_v28  ;;  %v98_v42 = vmax.f32 %v68_v28, 0.0 }
  0x93   :  { %v156_v30 = vpop.eup %155  ;;  %v100_v31 = vsub.f32 0.0, %v99_v29 }
  0x94   :  { %v74_v32 = vadd.f32 1.0, %v156_v30 }
  0x95   :  { %v101_v33 = vmul.f32 1.442695, %v100_v31 }
  0x96   :  { %157 = vlog2.f32 %v74_v32 }
  0x97   :  { %159 = vpow2.f32 %v101_v33 }
  0x9c   :  { %v158_v34 = vpop.eup %157 }
  0x9d   :  { %v160_v35 = vpop.eup %159  ;;  %v76_v37 = vmul.f32 0.6931472, %v158_v34 }
  0x9e   :  { %v103_v38 = vadd.f32 1.0, %v160_v35 }
  0x9f   :  { %v77_v39 = vadd.f32 %v76_v37, %v69_v36 }
  0xa0   :  { %161 = vlog2.f32 %v103_v38 }
  0xa1   :  { %v79_v40 = vsel %vm78_vm1, %v77_v39, 0.0  ;;  %163 = vrcp.f32 %v206_v46 }
  0xa2   :  { %80 = vadd.xlane.f32.xlu1 %v79_v40 }
  0xa6   :  { %v162_v41 = vpop.eup %161 }
  0xa7   :  { %v105_v43 = vmul.f32 0.6931472, %v162_v41  ;;  %v164_v47 = vpop.eup %163 }
  0xa8   :  { %v90_v48 = vmul.f32 4.0, %v164_v47  ;;  %vm94_vm2 = vweird.f32 %v164_v47 }
  0xa9   :  { %v106_v44 = vadd.f32 %v105_v43, %v98_v42 }
  0xaa   :  { %v91_v49 = vsub.f32 1.0, %v90_v48 }
  0xab   :  { %v107_v45 = vsel %vm78_vm1, %v106_v44, 0.0 }
  0xac   :  { %108 = vadd.xlane.f32.xlu1 %v107_v45  ;;  %v92_v53 = vmul.f32 %v164_v47, %v91_v49 }
  0xae   :  { %v93_v56 = vadd.f32 %v164_v47, %v92_v53 }
  0xb0   :  { %v95_v61 = vsel %vm94_vm2, %v164_v47, %v93_v56 }
 0x115   :  { %v81_v50 = vpop.xlane.xlu1 %80 }
 0x116   :  { %v82_v51 = vrot.slane %v81_v50, 4 }
 0x118   :  { %v83_v52 = vadd.f32 %v82_v51, %v81_v50 }
 0x11a   :  { %v84_v54 = vrot.slane %v83_v52, 2 }
 0x11c   :  { %v85_v55 = vadd.f32 %v84_v54, %v83_v52 }
 0x11e   :  { %v86_v57 = vrot.slane %v85_v55, 1 }
 0x11f   :  { %v109_v58 = vpop.xlane.xlu1 %108 }
 0x120   :  { %v110_v59 = vrot.slane %v109_v58, 4  ;;  %v87_v60 = vadd.f32 %v86_v57, %v85_v55 }
 0x122   :  { %v111_v62 = vadd.f32 %v110_v59, %v109_v58  ;;  %146 = vpush %v87_v60 }
 0x123   :  { %148 = vpush %v95_v61 }
 0x124   :  { %v112_v63 = vrot.slane %v111_v62, 2 }
 0x126   :  { %v113_v0 = vadd.f32 %v112_v63, %v111_v62 }
 0x128   :  { %v114_v1 = vrot.slane %v113_v0, 1 }
 0x12a   :  { %v115_v2 = vadd.f32 %v114_v1, %v113_v0 }
 0x12c   :  { %150 = vpush %v115_v2 }
 0x153   :  { %s147_s0 = spop %146 }
 0x154   :  { %s149_s21 = spop %148 }
 0x155   :  { %s97_s25 = smul.f32 %s149_s21, %s147_s0 }
 0x15d   :  { %s151_s26 = spop %150 }
 0x15e   :  { %s125_s27 = smul.f32 %s151_s26, %s149_s21 }
 0x160   :  { %s126_s28 = sadd.f32 %s125_s27, %s97_s25 }
 0x162   :  { %128 = sst [smem:[#allocation5]] %s126_s28 }
 0x163   :  { %137 = dma.smem_to_hbm %s207_s29, 16, %s135_s24, [#allocation4]  }
 0x164   :  { %203 = dma.done.wait [#allocation4], 16  }
 0x165   :  { %204 = vsyncadd [#allocation4], 4294967280 }
 0x166   :  { %142 = sfence }
 0x167   :  { %143 = vsyncpa [#allocation3], 1 }
 0x168   :  { %144 = vsyncpa [#allocation4], 1 }

</bundles_post_ra>
